<compile_context>
chip_gen: v7x
topology: tpu7x:2x2x1
jax: 0.10.0
libtpu: 0.0.40
codegen_flags: <defaults>
</compile_context>

<pallas_src>
import functools

import jax
import jax.numpy as jnp
from jax.experimental import pallas as pl
from jax.experimental.pallas import tpu as pltpu


def _perfect_fill_kernel(yeff_ref, out_ref, *, tv):
    # yeff_ref: (L, G)      int32 -- target id if present & valid, else -2.
    # out_ref:  (L, G, tv)  int32 -- output slab for vocab tile pl.program_id(0).
    #
    # Fold the tile offset into the (small) compared value so each output
    # element is exactly one compare + one select (v5e store-bound path).
    rel = yeff_ref[...] - pl.program_id(0) * tv                     # (L, G)
    lane = jax.lax.broadcasted_iota(jnp.int32, out_ref.shape, 2)    # (L, G, tv)
    out_ref[...] = jnp.where(lane == rel[:, :, None],
                             jnp.int32(1), jnp.int32(-1))


def _choose_tv(num_vocab, l, g, max_block_bytes=6 << 20):
    """Largest lane-dense (multiple-of-128) vocab tile dividing V whose int32
    output block fits the per-buffer VMEM budget; prefer >= 2 tiles so the
    parallel grid axis can shard across the two TensorCores of a v7x chip."""
    max_elems = max(128, max_block_bytes // (4 * l * g))
    divisors = [t for t in range(128, num_vocab + 1, 128) if num_vocab % t == 0]
    if not divisors:
        # No multiple-of-128 divisor: whole vocab as one full-dim block.
        return num_vocab
    fitting = [t for t in divisors if t <= max_elems] or [divisors[0]]
    tv = max(fitting)
    if num_vocab // tv < 2 and len(fitting) >= 2:
        tv = sorted(fitting)[-2]
    return tv


def perfect_model_pred(node_vocab_ids, y_vocab, *, num_vocab, max_seq_len):
    """node_vocab_ids: [G, N] int32 (padding = num_vocab);
    y_vocab: [G, L] int32 (padding = -1).
    Returns [max_seq_len, G, num_vocab] int32 (stacked PyTorch pred_list)."""
    G, _ = node_vocab_ids.shape
    L, V = max_seq_len, num_vocab
    assert y_vocab.shape == (G, L)

    # --- hoisted membership test ("y_eff trick"): L*G*N compare, tiny vs the
    # --- L*G*V output fill that the kernel performs.
    y_lg = jnp.transpose(y_vocab, (1, 0)).astype(jnp.int32)             # (L, G)
    nodes = node_vocab_ids.astype(jnp.int32)                            # (G, N)
    present = jnp.any(nodes[None, :, :] == y_lg[:, :, None], axis=-1)   # (L, G)
    valid = (y_lg >= 0) & (y_lg < V)                                    # (L, G)
    y_eff = jnp.where(present & valid, y_lg, jnp.int32(-2))             # (L, G)

    # --- pad graphs up to a multiple of 8 sublanes so stores stay full-width.
    Gp = -(-G // 8) * 8
    if Gp != G:
        y_eff = jnp.pad(y_eff, ((0, 0), (0, Gp - G)), constant_values=-2)

    tv = _choose_tv(V, L, Gp)
    kernel = functools.partial(_perfect_fill_kernel, tv=tv)

    out = pl.pallas_call(
        kernel,
        out_shape=jax.ShapeDtypeStruct((L, Gp, V), jnp.int32),
        grid_spec=pltpu.PrefetchScalarGridSpec(
            num_scalar_prefetch=0,
            grid=(V // tv,),
            # y_eff is resident: same block every step -> DMA'd once, no
            # per-step micro-DMAs.
            in_specs=[pl.BlockSpec((L, Gp), lambda v: (0, 0))],
            # Large lane-dense output slab per step: whole seq axis + big
            # multiple-of-128 vocab tile -> unmasked full-width stores.
            out_specs=pl.BlockSpec((L, Gp, tv), lambda v: (0, 0, v)),
        ),
        compiler_params=pltpu.CompilerParams(
            dimension_semantics=("parallel",),
            vmem_limit_bytes=32 << 20,   # safe on v5e/v6e/v7x; blocks sized well under it
        ),
    )(y_eff)

    if Gp != G:
        out = out[:, :G, :]
    return out


def _reference(node_vocab_ids, y_vocab, num_vocab):
    """Pure-JAX reference of the forward semantics."""
    V = num_vocab
    y_lg = y_vocab.T                                                       # (L, G)
    present = jnp.any(node_vocab_ids[None] == y_lg[:, :, None], axis=-1)   # (L, G)
    valid = (y_lg >= 0) & (y_lg < V)
    vocab = jnp.arange(V, dtype=jnp.int32)
    hit = (vocab[None, None, :] == y_lg[:, :, None]) & (present & valid)[:, :, None]
    return jnp.where(hit, 1, -1).astype(jnp.int32)


if __name__ == "__main__":
    key = jax.random.PRNGKey(0)
    G, N, V, L, A = 8, 16, 256, 8, 64   # graphs, max nodes/graph, vocab, seq len, attr ids

    # __init__ glue: attridx2vocabidx dict -> dense lookup table (unmapped attrs -> V)
    attr_ids = jnp.arange(A, dtype=jnp.int32)
    attr2vocab = jnp.where(attr_ids % 3 == 0, jnp.int32(V),
                           (attr_ids * 7) % V).astype(jnp.int32)

    k1, k2, k3 = jax.random.split(key, 3)
    # batched_data.x[:, 1] per graph, padded to N nodes
    node_attr = jax.random.randint(k1, (G, N), 0, A, dtype=jnp.int32)
    node_counts = jax.random.randint(k2, (G,), 4, N + 1, dtype=jnp.int32)
    node_mask = jnp.arange(N)[None, :] < node_counts[:, None]

    # forward glue: map attr idx -> vocab idx (the python dict loop in the module)
    node_vocab_ids = jnp.take(attr2vocab, node_attr)
    node_vocab_ids = jnp.where(node_mask, node_vocab_ids, jnp.int32(V))

    # batched_data.y mapped through vocab2idx; -1 marks padded / filtered positions
    y_vocab = jax.random.randint(k3, (G, L), 0, V, dtype=jnp.int32)
    y_vocab = y_vocab.at[:, 0].set(node_vocab_ids[:, 0])   # make some targets present
    y_vocab = y_vocab.at[:, L - 2:].set(-1)                # short sequences

    pred = perfect_model_pred(node_vocab_ids, y_vocab, num_vocab=V, max_seq_len=L)
    pred = jax.block_until_ready(pred)

    ref = _reference(node_vocab_ids, y_vocab, V)
    assert pred.shape == (L, G, V) and pred.dtype == jnp.int32
    assert bool(jnp.all(pred == ref)), "Pallas kernel mismatch vs reference"
    print("KERNEL_OK")
</pallas_src>

<mosaic_0001>
module attributes {stable_mosaic.version = 11 : i64} {
  func.func @_perfect_fill_kernel(%arg0: i32, %arg1: memref<8x8xi32, #tpu.memory_space<vmem>>, %arg2: memref<8x8x128xi32, #tpu.memory_space<vmem>>) attributes {dimension_semantics = [#tpu.dimension_semantics<parallel>], iteration_bounds = array<i64: 2>, scalar_prefetch = 0 : i64, scratch_operands = 0 : i64, tpu.core_type = #tpu.core_type<tc>, window_params = [{pipeline_mode = #tpu.pipeline_mode<synchronous>, transform_indices = @transform_0, window_bounds = array<i64: 8, 8>}, {transform_indices = @transform_1, window_bounds = array<i64: 8, 8, 128>}]} {
    %c0 = arith.constant 0 : index
    %c0_0 = arith.constant 0 : index
    %0 = vector.load %arg1[%c0, %c0_0] : memref<8x8xi32, #tpu.memory_space<vmem>>, vector<8x8xi32>
    %c128_i32 = arith.constant 128 : i32
    %1 = arith.muli %arg0, %c128_i32 : i32
    %2 = vector.broadcast %1 : i32 to vector<8x8xi32>
    %3 = arith.subi %0, %2 : vector<8x8xi32>
    %4 = tpu.iota {dimensions = array<i32: 2>} : vector<8x8x128xi32>
    %5 = vector.shape_cast %3 : vector<8x8xi32> to vector<8x8x1xi32>
    %6 = vector.broadcast %5 : vector<8x8x1xi32> to vector<8x8x128xi32>
    %7 = arith.cmpi eq, %4, %6 : vector<8x8x128xi32>
    %c1_i32 = arith.constant 1 : i32
    %c-1_i32 = arith.constant -1 : i32
    %8 = vector.broadcast %c1_i32 : i32 to vector<8x8x128xi32>
    %9 = vector.broadcast %c-1_i32 : i32 to vector<8x8x128xi32>
    %10 = arith.select %7, %8, %9 : vector<8x8x128xi1>, vector<8x8x128xi32>
    %c0_1 = arith.constant 0 : index
    %c0_2 = arith.constant 0 : index
    %c0_3 = arith.constant 0 : index
    %11 = vector.load %arg2[%c0_1, %c0_2, %c0_3] : memref<8x8x128xi32, #tpu.memory_space<vmem>>, vector<8x8x128xi32>
    tpu.vector_store %arg2[%c0_1, %c0_2, %c0_3], %10 {strides = array<i32>} : memref<8x8x128xi32, #tpu.memory_space<vmem>>, vector<8x8x128xi32>,
    return
  }
  func.func @transform_0(%arg0: i32) -> (i32, i32) {
    %c0_i32 = arith.constant 0 : i32
    %c0_i32_0 = arith.constant 0 : i32
    %c0_i32_1 = arith.constant 0 : i32
    return %c0_i32, %c0_i32_0 : i32, i32
  }
  func.func @transform_1(%arg0: i32) -> (i32, i32, i32) {
    %c0_i32 = arith.constant 0 : i32
    %c0_i32_0 = arith.constant 0 : i32
    %c0_i32_1 = arith.constant 0 : i32
    return %c0_i32, %c0_i32_0, %arg0 : i32, i32, i32
  }
}

</mosaic_0001>

<bundles_post_ra>
// kernel: tpu_custom_call.1
= control target key start
LH: loop header
LB: loop body
LE: loop exit
PB: predicated region body
PF: predicated region fallthrough
CT: control target
= control target key end

     0   :  { %6 = vsyncpa [#allocation3], 0  ;;  %s587_s0 = inlined_call_operand.hbm [shape: s32[8,8], index: 0, kind: input, shape index: {}]   ;;  %s588_s1 = inlined_call_operand.hbm [shape: s32[8,8,256], index: 1, kind: output, shape index: {}]  }
   0x1   :  { %7 = vsyncpa [#allocation4], 0 }
   0x2   :  { %9 = vsyncpa [#allocation4 + $0x1], 0  ;;  %s446_s6 = smov 0   ;;  %s448_s7 = smov 0  }
   0x3   :  { %s450_s8 = smov 0   ;;  %s452_s9 = smov 0  }
   0x4 LB: > { %s467_s10 = sadd.s32 4294967295, %s428_s9   ;;  %s269_s11 = sadd.s32 4294967294, %s428_s9   ;;  %s428_s9 = sphi %s452_s9, %s604_s9   ;;  %s424_s8 = sphi %s450_s8, %s603_s8   ;;  %s420_s7 = sphi %s448_s7, %s602_s7   ;;  %s416_s6 = sphi %s446_s6, %s601_s6  }
   0x5   : > { %s471_s12 = sadd.s32 1, %s428_s9   ;;  %s43_s13 = sadd.s32 1, %s424_s8 }
   0x6   : > { %s40_s14 = ssub.s32 %s428_s9, %s471_s12  ;;  %p53_p0 = scmp.ne.s32.totalorder %s424_s8, %s420_s7 }
   0x7   : > { %p41_p1 = scmp.eq.s32.totalorder %s40_s14, 0  ;;  %p54_p2 = scmp.eq.s32.totalorder %s467_s10, 1 }
   0x8   : > { %p59_p3 = scmp.ne.s32.totalorder %s420_s7, %s416_s6  ;;  %p60_p4 = scmp.eq.s32.totalorder %s269_s11, 1 }
   0x9   : > { %s482_s15 = scalar_select %p41_p1, %s424_s8, %s43_s13  }
   0xa   : > { %p484_p5 = por %p54_p2, %p53_p0  ;;  %p488_p6 = por %p60_p4, %p59_p3 }
   0xb   : > { %p270_p7 = scmp.ge.s32.totalorder %s428_s9, 1  ;;  %p67_p8 = scmp.lt.s32.totalorder %s428_s9, 3 }
   0xc   : > { %s592_s16 = scalar_select %p484_p5, 1, 0 }
   0xd   : > { %s593_s17 = scalar_select %p488_p6, 1, 0 }
   0xe   : > { %p589_p9 = scmp.eq.s32.totalorder %s467_s10, 0  ;;  %p495_p10 = pnand %p270_p7, %p67_p8 }
   0xf   : > { %s430_s19 = smov [#allocation2]   ;;  %s334_s24 = scalar_lea.hbm %s587_s0, 128 }
  0x10   : > { %s594_s18 = scalar_select %p495_p10, 1, 0 }
  0x11   : > { %s80_s20 = sshll.u32 %s430_s19, 4  ;;  %p286_p11 = pneg %p495_p10  ;;  %s81_s20 = int_to_ptr.vmem [resolvable:$true] %s80_s20 }
  0x12   : > { %p335_p13 = scmp.ne.s32.totalorder %s587_s0, %s334_s24  ;;  %p341_p3 = scmp.lt.u32.totalorder %s334_s24, %s587_s0 }
  0x13   : > { %p503_p12 = pnand %p589_p9, %p286_p11 }
  0x15   : > { %p336_p0 = pneg %p503_p12 }
  0x17   : > { %p337_p1 = pnand %p336_p0, %p335_p13 }
  0x19   : > { %p338_p2 = pneg %p337_p1 }
  0x1b   : > { %p343_p4 = pnand %p341_p3, %p338_p2 }
  0x1d   : > { %346 = shalt.err (!%p343_p4)
}
  0x1e   : > { %s347_s29 = scalar_lea.vmem %s81_s20, 128  ;;  %p355_p9 = scmp.lt.s32.totalorder %s81_s20, %s81_s20 }
  0x1f   : > { %p348_p7 = scmp.ne.s32.totalorder %s81_s20, %s347_s29  ;;  %p356_p6 = scmp.lt.s32.totalorder %s347_s29, %s347_s29 }
  0x21   : > { %p350_p8 = pnand %p348_p7, %p336_p0  ;;  %p357_p5 = por %p356_p6, %p355_p9 }
  0x23   : > { %p351_p11 = pneg %p350_p8 }
  0x25   : > { %p358_p10 = pnand %p357_p5, %p351_p11 }
  0x27   : > { %361 = shalt.err (!%p358_p10)
}
  0x28   : > { %289 = dma.hbm_to_vmem [thread:$0]  (!%p503_p12), %s587_s0, 128, %s81_s20, [#allocation3]  }
  0x29   : > { %p596_p13 = scmp.ne.s32.totalorder %s594_s18, 0 }
  0x2a   : > { %p597_p1 = scmp.eq.s32.totalorder (!%p596_p13), %s467_s10, 0 }
  0x2b   : > { %93 = sbr.rel (%p596_p13) target bundleno = 204 (0xcc), region = 24 }
  0x32   : > { %407 = dma.done.wait (%p597_p1), [#allocation3], 128   ;;  %p598_p0 = pmov %p597_p1 }
  0x33   : > { %v112_v0 = vlaneseq  ;;  %s275_s3 = sshll.u32 %s467_s10, 7  ;;  %v108_v5 = vld [vmem:[#allocation2] sm:$0xff]  ;;  %s105_s4 = sand.u32 1, %s420_s7   ;;  %v431_v24 = vmov 4294967295  }
  0x34   : > { %409 = vsyncadd (%p598_p0), [#allocation3], 4294967168  ;;  %v110_v2 = vstv %s275_s3  ;;  %s274_s5 = sshll.u32 %s105_s4, 6  ;;  %s540_s19 = scalar_lea.hbm %s588_s1, %s275_s3 }
  0x35   : > { %v115_v1 = vshrl.u32 %v112_v0, 7  ;;  %v111_v6 = vsub.s32 %v108_v5, %v110_v2  ;;  %v113_v21 = vand.u32 127, %v112_v0  ;;  %s107_s11 = scalar_lea.vmem [#allocation5], %s274_s5  ;;  %s546_s10 = scalar_lea.sflag [#allocation4], %s105_s4 }
  0x36   : > { %s207_s13 = sshll.u32 %s107_s11, 4  ;;  %p599_p6 = scmp.ne.s32.totalorder %s592_s16, 0  ;;  %s542_s13 = int_to_ptr.vmem [resolvable:$true] %s207_s13 }
  0x37   : > { %v130_v3 = vsub.s32 2, %v115_v1  ;;  %v116_v4 = vsub.s32 0, %v115_v1  ;;  %v137_v7 = vsub.s32 3, %v115_v1  ;;  %v123_v8 = vsub.s32 1, %v115_v1  ;;  %s362_s20 = scalar_lea.vmem %s542_s13, 1024  ;;  %s432_s21 = smov [#allocation5]  }
  0x38   : > { %v151_v13 = vsub.s32 5, %v115_v1  ;;  %v144_v14 = vsub.s32 4, %v115_v1  ;;  %v165_v17 = vsub.s32 7, %v115_v1  ;;  %v158_v18 = vsub.s32 6, %v115_v1  ;;  %p363_p5 = scmp.ne.s32.totalorder %s542_s13, %s362_s20  ;;  %s366_s22 = sshll.u32 %s432_s21, 4  ;;  %s367_s22 = int_to_ptr.vmem [resolvable:$false] %s366_s22 }
  0x39   : > { %v131_v9 = vrot.slane %v111_v6, %v130_v3  ;;  %v117_v10 = vrot.slane %v111_v6, %v116_v4  ;;  %v138_v11 = vrot.slane %v111_v6, %v137_v7  ;;  %v124_v12 = vrot.slane %v111_v6, %v123_v8  ;;  %s368_s23 = scalar_lea.vmem %s367_s22, 2048  ;;  %p369_p12 = scmp.lt.s32.totalorder %s542_s13, %s367_s22 }
  0x3a   : > { %v152_v15 = vrot.slane %v111_v6, %v151_v13  ;;  %v145_v16 = vrot.slane %v111_v6, %v144_v14  ;;  %v166_v19 = vrot.slane %v111_v6, %v165_v17  ;;  %v159_v20 = vrot.slane %v111_v6, %v158_v18  ;;  %p364_p9 = pnand %p363_p5, %p599_p6  ;;  %p370_p2 = scmp.lt.s32.totalorder %s368_s23, %s362_s20 }
  0x3b   : > { %133 = vbcast.lane.b32.xlu1 %v131_v9, 256  ;;  %119 = vbcast.lane.b32.xlu0 %v117_v10, 256 }
  0x3c   : > { %p365_p10 = pneg %p364_p9  ;;  %p371_p3 = por %p370_p2, %p369_p12 }
  0x3e   : > { %p372_p4 = pnand %p371_p3, %p365_p10 }
  0x3f   : > { %140 = vbcast.lane.b32.xlu1 %v138_v11, 256  ;;  %126 = vbcast.lane.b32.xlu0 %v124_v12, 256 }
  0x43   : > { %154 = vbcast.lane.b32.xlu1 %v152_v15, 256  ;;  %147 = vbcast.lane.b32.xlu0 %v145_v16, 256 }
  0x47   : > { %168 = vbcast.lane.b32.xlu1 %v166_v19, 256  ;;  %161 = vbcast.lane.b32.xlu0 %v159_v20, 256 }
  0xad   : > { %v134_v22 = vpop.permute.xlu1 %133  ;;  %v120_v23 = vpop.permute.xlu0 %119 }
  0xae   : > { %vm172_vm0 = vcmp.eq.s32.totalorder %v113_v21, %v134_v22  ;;  %vm170_vm1 = vcmp.eq.s32.totalorder %v113_v21, %v120_v23 }
  0xaf   : > { %v180_v25 = vsel %vm172_vm0, 1, %v431_v24  ;;  %v178_v26 = vsel %vm170_vm1, 1, %v431_v24 }
  0xb0   : > { %188 = vst [vmem:[%s107_s11 + $0x10] sm:$0xff] %v180_v25  ;;  %186 = vst [vmem:[%s107_s11] sm:$0xff] %v178_v26 }
  0xb1   : > { %v141_v27 = vpop.permute.xlu1 %140  ;;  %v127_v28 = vpop.permute.xlu0 %126 }
  0xb2   : > { %vm173_vm2 = vcmp.eq.s32.totalorder %v113_v21, %v141_v27  ;;  %vm171_vm3 = vcmp.eq.s32.totalorder %v113_v21, %v127_v28 }
  0xb3   : > { %v181_v29 = vsel %vm173_vm2, 1, %v431_v24  ;;  %v179_v30 = vsel %vm171_vm3, 1, %v431_v24 }
  0xb4   : > { %189 = vst [vmem:[%s107_s11 + $0x18] sm:$0xff] %v181_v29  ;;  %187 = vst [vmem:[%s107_s11 + $0x8] sm:$0xff] %v179_v30 }
  0xb5   : > { %v155_v31 = vpop.permute.xlu1 %154  ;;  %v148_v32 = vpop.permute.xlu0 %147 }
  0xb6   : > { %vm175_vm4 = vcmp.eq.s32.totalorder %v113_v21, %v155_v31  ;;  %vm174_vm5 = vcmp.eq.s32.totalorder %v113_v21, %v148_v32 }
  0xb7   : > { %v183_v33 = vsel %vm175_vm4, 1, %v431_v24  ;;  %v182_v34 = vsel %vm174_vm5, 1, %v431_v24 }
  0xb8   : > { %191 = vst [vmem:[%s107_s11 + $0x28] sm:$0xff] %v183_v33  ;;  %190 = vst [vmem:[%s107_s11 + $0x20] sm:$0xff] %v182_v34 }
  0xb9   : > { %v169_v35 = vpop.permute.xlu1 %168  ;;  %v162_v36 = vpop.permute.xlu0 %161 }
  0xba   : > { %vm177_vm6 = vcmp.eq.s32.totalorder %v113_v21, %v169_v35  ;;  %vm176_vm7 = vcmp.eq.s32.totalorder %v113_v21, %v162_v36 }
  0xbb   : > { %v185_v37 = vsel %vm177_vm6, 1, %v431_v24  ;;  %v184_v38 = vsel %vm176_vm7, 1, %v431_v24 }
  0xbc   : > { %193 = vst [vmem:[%s107_s11 + $0x38] sm:$0xff] %v185_v37  ;;  %192 = vst [vmem:[%s107_s11 + $0x30] sm:$0xff] %v184_v38 }
  0xbd   : > { %375 = shalt.err (!%p372_p4)
}
  0xbe   : > { %s376_s24 = scalar_lea.hbm %s540_s19, 1024  ;;  %s380_s27 = scalar_lea.hbm %s588_s1, 2048 }
  0xbf   : > { %p377_p7 = scmp.ne.s32.totalorder %s540_s19, %s376_s24  ;;  %p381_p13 = scmp.lt.u32.totalorder %s540_s19, %s588_s1 }
  0xc0   : > { %p382_p1 = scmp.lt.u32.totalorder %s380_s27, %s376_s24  ;;  %p384_p5 = scmp.lt.u32.totalorder %s376_s24, %s540_s19 }
  0xc1   : > { %p378_p8 = pnand %p377_p7, %p599_p6 }
  0xc2   : > { %p383_p0 = por %p382_p1, %p381_p13 }
  0xc3   : > { %p379_p11 = pneg %p378_p8 }
  0xc4   : > { %p385_p9 = por %p384_p5, %p383_p0 }
  0xc6   : > { %p386_p10 = pnand %p385_p9, %p379_p11 }
  0xc8   : > { %389 = shalt.err (!%p386_p10)
}
  0xc9   : > { %s433_s30 = smov 128   ;;  %s434_s2 = smov 256  }
  0xca   : > { %s435_s3 = smov 8  }
  0xcb   : > { %284 = dma.vmem_to_hbm [thread:$0]  (%p599_p6), %s542_s13, 1024, %s540_s19, %s546_s10, %s433_s30, %s434_s2, %s435_s3  }
  0xcc PF: > { %p296_p12 = scmp.ge.s32.totalorder %s428_s9, 2  ;;  %s222_s4 = sand.u32 1, %s416_s6  }
  0xcd   : > { %p600_p2 = scmp.ne.s32.totalorder %s593_s17, 0  ;;  %s223_s5 = scalar_lea.sflag [#allocation4], %s222_s4 }
  0xcf   : > { %p291_p3 = pnand %p296_p12, %p600_p2 }
  0xd1   : > { %411 = dma.done.wait (!%p291_p3), %s223_s5, 1024  }
  0xd2   : > { %413 = vsyncadd (!%p291_p3), %s223_s5, 4294966272  ;;  %p12_p4 = scmp.ge.s32.totalorder %s471_s12, 4   ;;  %s601_s6 = smov %s420_s7 }
  0xd3   : > { %s602_s7 = smov %s424_s8  ;;  %s603_s8 = smov %s482_s15 }
  0xd4   : > { %s604_s9 = smov %s471_s12  ;;  %14 = sbr.rel (!%p12_p4) target bundleno = 4 (0x4), region = 61 }
  0xdb   :  { %228 = vsyncpa [#allocation3], 1 }
  0xdc   :  { %230 = vsyncpa [#allocation3 + $0x1], 1 }
  0xdd   :  { %231 = vsyncpa [#allocation4], 1 }
  0xde   :  { %233 = vsyncpa [#allocation4 + $0x1], 1 }

</bundles_post_ra>
